<compile_context>
chip_gen: v7x
topology: tpu7x:2x2x1
jax: 0.10.0
libtpu: 0.0.40
codegen_flags: <defaults>
</compile_context>

<pallas_src>
import jax
import jax.numpy as jnp
from jax.experimental import pallas as pl
from jax.experimental.pallas import tpu as pltpu


def update_block_kernel(s_ref, v_ref, wuv_ref, buv_ref, w1_ref, b1_ref,
                        w2_ref, b2_ref, s_out_ref, v_out_ref):
    F = s_ref.shape[-1]
    tn = s_ref.shape[0]

    s_bf = s_ref[...]                                # (TN, F)   bf16
    vf_bf = v_ref[...].reshape(3 * tn, F)            # (3*TN, F) bf16 lane-dense slab

    # --- Fused U|V projection: one bf16 MXU matmul, f32 accumulate ----------
    uv = (jnp.dot(vf_bf, wuv_ref[...], preferred_element_type=jnp.float32)
          + buv_ref[...])                            # (3*TN, 2F) f32

    # Per-spatial-plane views of the slab (sublane splits at multiples of tn,
    # lane split at F = multiple of 128 -> zero-copy slices).
    U0, V0 = uv[0 * tn:1 * tn, :F], uv[0 * tn:1 * tn, F:]
    U1, V1 = uv[1 * tn:2 * tn, :F], uv[1 * tn:2 * tn, F:]
    U2, V2 = uv[2 * tn:3 * tn, :F], uv[2 * tn:3 * tn, F:]

    # ||V|| over the spatial axis (3 planes) -> (TN, F) f32
    V_norm = jnp.sqrt(V0 * V0 + V1 * V1 + V2 * V2)

    # --- net layer 1, fused K=2F: cat([V_norm, s]) @ W1^T + b1, then SiLU ---
    # Concat materialized in bf16 (s is already bf16) -> half the VMEM copy.
    sv_bf = jnp.concatenate([V_norm.astype(jnp.bfloat16), s_bf], axis=1)   # (TN, 2F)
    h = (jnp.dot(sv_bf, w1_ref[...], preferred_element_type=jnp.float32)
         + b1_ref[...])                              # (TN, F) f32
    # SiLU in bf16: h is fed to the bf16 MXU right after anyway (v6e/v7x have
    # bf16 VPU/EUP paths).
    # TODO(synk): on v5e (no bf16 VPU/EUP, 128-deep MXU) keep the SiLU in f32
    #             and split layer 1 into two K=F matmuls, dropping the concat.
    h_bf = h.astype(jnp.bfloat16)
    h_bf = h_bf * jax.nn.sigmoid(h_bf)

    # --- net layer 2: (TN, F) @ (F, 3F) + b2 --------------------------------
    a = (jnp.dot(h_bf, w2_ref[...], preferred_element_type=jnp.float32)
         + b2_ref[...])                              # (TN, 3F) f32
    avv = a[:, :F]
    asv = a[:, F:2 * F]
    ass = a[:, 2 * F:]

    # --- gating + residuals (f32 elementwise tail, bf16 stores) -------------
    product = U0 * V0 + U1 * V1 + U2 * V2            # sum over spatial axis
    s_out_ref[...] = (s_bf.astype(jnp.float32) + product * asv + ass
                      ).astype(s_out_ref.dtype)

    v0 = vf_bf[0 * tn:1 * tn].astype(jnp.float32)
    v1 = vf_bf[1 * tn:2 * tn].astype(jnp.float32)
    v2 = vf_bf[2 * tn:3 * tn].astype(jnp.float32)
    v_out_ref[0] = (v0 + avv * U0).astype(v_out_ref.dtype)
    v_out_ref[1] = (v1 + avv * U1).astype(v_out_ref.dtype)
    v_out_ref[2] = (v2 + avv * U2).astype(v_out_ref.dtype)


def _pick_tn(N):
    """Row tile: multiple of 16 rows (bf16 sublane pack), <= 256 rows, and
    >= 2 grid steps whenever N >= 32 so both v7x TensorCores get work."""
    if N < 32:
        return N                                  # single tile (block == full dim)
    step = 16 if N % 16 == 0 else (8 if N % 8 == 0 else 0)
    if step == 0:
        return N
    start = (min(256, N // 2) // step) * step
    for t in range(start, step - 1, -step):
        if N % t == 0:
            return t
    return N


def update_block(s, v3, params, *, tn=None):
    """s: (N, F) bf16 (or f32); v3: (3, N, F) spatial-first, same dtype.
    Returns (s_new, v3_new) in the input dtypes.

    For tiny molecules, batch several graphs along the row axis (concatenate
    their s / v3 along N) before calling — that is the only lever that fills
    the MXU in the small-N regime."""
    N, F = s.shape
    assert v3.shape == (3, N, F)
    assert F % 128 == 0, "F must be a multiple of 128 (lane-dense slicing)"
    if tn is None:
        tn = _pick_tn(N)
    assert N % tn == 0
    assert tn % 8 == 0 or tn == N

    wuv, buv, w1_t, b1, w2_t, b2 = params

    def w_spec(shape):
        # Grid-invariant weights/biases. For large F, single-buffer them so the
        # default double-buffering does not eat the scoped VMEM budget
        # (v7x: 32 MiB scoped / 64 MiB physical; v5e: 16 MiB scoped).
        if F >= 256:
            return pl.BlockSpec(shape, lambda i: (0,) * len(shape),
                                pipeline_mode=pl.Buffered(1))
        return pl.BlockSpec(shape, lambda i: (0,) * len(shape))

    # Advisory cost estimate so XLA overlaps this (possibly small) kernel.
    flops = 2 * N * (3 * F * 2 * F) + 2 * N * (2 * F * F) + 2 * N * (F * 3 * F)
    act_bytes = 2 * (N * F * s.dtype.itemsize + 3 * N * F * v3.dtype.itemsize)
    w_bytes = sum(int(p.size) * p.dtype.itemsize for p in params)
    cost = pl.CostEstimate(flops=int(flops),
                           transcendentals=int(2 * N * F),   # sqrt + sigmoid
                           bytes_accessed=int(act_bytes + w_bytes))

    # Explicit scoped-VMEM limit (defaults: 16 MiB v5e / 32 MiB v6e,v7x).
    w_bufs = 1 if F >= 256 else 2
    vmem_est = (2 * 2 * 4 * tn * F * s.dtype.itemsize   # act in+out, 2 buffers
                + w_bufs * w_bytes
                + 60 * tn * F)                           # f32 intermediates
    vmem_limit = int(min(max(2 * vmem_est, 32 * 1024 * 1024),
                         100 * 1024 * 1024))
    # TODO(synk): for F >= 1024 on v7x (64 MiB physical VMEM) also shrink tn
    #             and/or consider fp8 weight storage.

    grid_spec = pltpu.PrefetchScalarGridSpec(
        num_scalar_prefetch=0,
        grid=(N // tn,),
        in_specs=[
            pl.BlockSpec((tn, F), lambda i: (i, 0)),          # s   (bf16)
            pl.BlockSpec((3, tn, F), lambda i: (0, i, 0)),    # v   (bf16, spatial-first)
            w_spec((F, 2 * F)),     # Wu^T | Wv^T   (bf16)
            w_spec((1, 2 * F)),     # bu | bv       (f32)
            w_spec((2 * F, F)),     # W1^T          (bf16)
            w_spec((1, F)),         # b1            (f32)
            w_spec((F, 3 * F)),     # W2^T          (bf16)
            w_spec((1, 3 * F)),     # b2            (f32)
        ],
        out_specs=[
            pl.BlockSpec((tn, F), lambda i: (i, 0)),
            pl.BlockSpec((3, tn, F), lambda i: (0, i, 0)),
        ],
    )

    s_new, v3_new = pl.pallas_call(
        update_block_kernel,
        out_shape=(jax.ShapeDtypeStruct((N, F), s.dtype),
                   jax.ShapeDtypeStruct((3, N, F), v3.dtype)),
        grid_spec=grid_spec,
        compiler_params=pltpu.CompilerParams(
            dimension_semantics=("parallel",),
            vmem_limit_bytes=vmem_limit),
        cost_estimate=cost,
    )(s, v3, wuv, buv, w1_t, b1, w2_t, b2)

    return s_new, v3_new


def init_params(key, F):
    """Deterministic synthetic params. Returns (kernel params, raw torch-style params)."""
    ks = jax.random.split(key, 8)
    sc = 0.05
    wu = sc * jax.random.normal(ks[0], (F, F), jnp.float32)          # (out, in)
    bu = sc * jax.random.normal(ks[1], (1, F), jnp.float32)
    wv = sc * jax.random.normal(ks[2], (F, F), jnp.float32)
    bv = sc * jax.random.normal(ks[3], (1, F), jnp.float32)
    w1 = sc * jax.random.normal(ks[4], (F, 2 * F), jnp.float32)      # (out, in) = (F, 2F)
    b1 = sc * jax.random.normal(ks[5], (1, F), jnp.float32)
    w2 = sc * jax.random.normal(ks[6], (3 * F, F), jnp.float32)      # (out, in) = (3F, F)
    b2 = sc * jax.random.normal(ks[7], (1, 3 * F), jnp.float32)

    # Kernel params: (in, out) orientation, U|V fused, matmul weights in bf16.
    wuv = jnp.concatenate([wu.T, wv.T], axis=1).astype(jnp.bfloat16)  # (F, 2F)
    buv = jnp.concatenate([bu, bv], axis=1)                           # (1, 2F)  f32
    w1_t = w1.T.astype(jnp.bfloat16)                                  # (2F, F)
    w2_t = w2.T.astype(jnp.bfloat16)                                  # (F, 3F)

    params = (wuv, buv, w1_t, b1, w2_t, b2)
    raw = (wu, bu, wv, bv, w1, b1, w2, b2)
    return params, raw


def reference(s, v, raw_params):
    """Plain-JAX f32 replica of the PyTorch forward for verification."""
    wu, bu, wv, bv, w1, b1, w2, b2 = raw_params
    F = s.shape[-1]
    U = v @ wu.T + bu[0]                          # (N, 3, F)
    V = v @ wv.T + bv[0]
    V_norm = jnp.linalg.norm(V, axis=1)           # (N, F)
    sv = jnp.concatenate([V_norm, s], axis=1)     # (N, 2F)
    h = sv @ w1.T + b1[0]
    h = h * jax.nn.sigmoid(h)
    a = h @ w2.T + b2[0]                          # (N, 3F)
    avv, asv, ass = a[:, :F], a[:, F:2 * F], a[:, 2 * F:]
    d_v = avv[:, None, :] * U
    product = jnp.sum(U * V, axis=1)
    d_s = product * asv + ass
    return s + d_s, v + d_v


if __name__ == "__main__":
    key = jax.random.PRNGKey(0)
    F = 128                                          # embedding_size

    # N=16: tiny-molecule regime (grid=(1,)).  N=64: multi-step grid (tn=32,
    # grid=(2,)) exercising the parallel grid axis used by v7x megacore.
    for N in (16, 64):
        k_s, k_v, k_p = jax.random.split(jax.random.fold_in(key, N), 3)
        s_f32 = jax.random.normal(k_s, (N, F), jnp.float32)
        v_f32 = jax.random.normal(k_v, (N, 3, F), jnp.float32)   # PyTorch layout
        params, raw_params = init_params(k_p, F)

        # bf16 activation I/O at the kernel boundary (halves HBM traffic);
        # spatial-first (3, N, F) is the kernel's canonical v layout.
        s_bf = s_f32.astype(jnp.bfloat16)
        v3_bf = jnp.transpose(v_f32, (1, 0, 2)).astype(jnp.bfloat16)

        s_new, v3_new = update_block(s_bf, v3_bf, params)
        s_new, v3_new = jax.block_until_ready((s_new, v3_new))

        # f32 reference on the same bf16-rounded inputs.
        s_in = s_bf.astype(jnp.float32)
        v_in = jnp.transpose(v3_bf, (1, 0, 2)).astype(jnp.float32)
        s_ref, v_ref_out = reference(s_in, v_in, raw_params)

        s_out = s_new.astype(jnp.float32)
        v_out = jnp.transpose(v3_new, (1, 0, 2)).astype(jnp.float32)

        # bf16 matmul inputs / bf16 outputs -> loosened tolerance vs. f32 ref.
        assert jnp.allclose(s_out, s_ref, atol=5e-2, rtol=5e-2), f"s mismatch (N={N})"
        assert jnp.allclose(v_out, v_ref_out, atol=5e-2, rtol=5e-2), f"v mismatch (N={N})"

    print("KERNEL_OK")
</pallas_src>

<mosaic_0001>
module attributes {stable_mosaic.version = 11 : i64} {
  func.func @update_block_kernel(%arg0: i32, %arg1: memref<16x128xbf16, #tpu.memory_space<vmem>>, %arg2: memref<3x16x128xbf16, #tpu.memory_space<vmem>>, %arg3: memref<128x256xbf16, #tpu.memory_space<vmem>>, %arg4: memref<1x256xf32, #tpu.memory_space<vmem>>, %arg5: memref<256x128xbf16, #tpu.memory_space<vmem>>, %arg6: memref<1x128xf32, #tpu.memory_space<vmem>>, %arg7: memref<128x384xbf16, #tpu.memory_space<vmem>>, %arg8: memref<1x384xf32, #tpu.memory_space<vmem>>, %arg9: memref<16x128xbf16, #tpu.memory_space<vmem>>, %arg10: memref<3x16x128xbf16, #tpu.memory_space<vmem>>) attributes {dimension_semantics = [#tpu.dimension_semantics<parallel>], iteration_bounds = array<i64: 1>, scalar_prefetch = 0 : i64, scratch_operands = 0 : i64, tpu.core_type = #tpu.core_type<tc>, window_params = [{transform_indices = @transform_0, window_bounds = array<i64: 16, 128>}, {transform_indices = @transform_1, window_bounds = array<i64: 3, 16, 128>}, {pipeline_mode = #tpu.pipeline_mode<synchronous>, transform_indices = @transform_2, window_bounds = array<i64: 128, 256>}, {pipeline_mode = #tpu.pipeline_mode<synchronous>, transform_indices = @transform_3, window_bounds = array<i64: 1, 256>}, {pipeline_mode = #tpu.pipeline_mode<synchronous>, transform_indices = @transform_4, window_bounds = array<i64: 256, 128>}, {pipeline_mode = #tpu.pipeline_mode<synchronous>, transform_indices = @transform_5, window_bounds = array<i64: 1, 128>}, {pipeline_mode = #tpu.pipeline_mode<synchronous>, transform_indices = @transform_6, window_bounds = array<i64: 128, 384>}, {pipeline_mode = #tpu.pipeline_mode<synchronous>, transform_indices = @transform_7, window_bounds = array<i64: 1, 384>}, {transform_indices = @transform_8, window_bounds = array<i64: 16, 128>}, {transform_indices = @transform_9, window_bounds = array<i64: 3, 16, 128>}]} {
    %c0 = arith.constant 0 : index
    %c0_0 = arith.constant 0 : index
    %0 = vector.load %arg1[%c0, %c0_0] : memref<16x128xbf16, #tpu.memory_space<vmem>>, vector<16x128xbf16>
    %c0_1 = arith.constant 0 : index
    %c0_2 = arith.constant 0 : index
    %c0_3 = arith.constant 0 : index
    %1 = vector.load %arg2[%c0_1, %c0_2, %c0_3] : memref<3x16x128xbf16, #tpu.memory_space<vmem>>, vector<3x16x128xbf16>
    %2 = vector.shape_cast %1 : vector<3x16x128xbf16> to vector<48x128xbf16>
    %c0_4 = arith.constant 0 : index
    %c0_5 = arith.constant 0 : index
    %3 = vector.load %arg3[%c0_4, %c0_5] : memref<128x256xbf16, #tpu.memory_space<vmem>>, vector<128x256xbf16>
    %cst = arith.constant dense<0.000000e+00> : vector<48x256xf32>
    %4 = tpu.matmul %2, %3, %cst {dimension_numbers = #tpu.dot_dimension_numbers<[1], [0], [0], [1], [0, 0, 1, 1], [], []>} : vector<48x128xbf16>, vector<128x256xbf16>, vector<48x256xf32> -> vector<48x256xf32>
    %c0_6 = arith.constant 0 : index
    %c0_7 = arith.constant 0 : index
    %5 = vector.load %arg4[%c0_6, %c0_7] : memref<1x256xf32, #tpu.memory_space<vmem>>, vector<1x256xf32>
    %6 = vector.broadcast %5 : vector<1x256xf32> to vector<48x256xf32>
    %7 = arith.addf %4, %6 : vector<48x256xf32>
    %8 = vector.extract_strided_slice %7 {offsets = [0, 0], sizes = [16, 128], strides = [1, 1]} : vector<48x256xf32> to vector<16x128xf32>
    %9 = vector.extract_strided_slice %7 {offsets = [0, 128], sizes = [16, 128], strides = [1, 1]} : vector<48x256xf32> to vector<16x128xf32>
    %10 = vector.extract_strided_slice %7 {offsets = [16, 0], sizes = [16, 128], strides = [1, 1]} : vector<48x256xf32> to vector<16x128xf32>
    %11 = vector.extract_strided_slice %7 {offsets = [16, 128], sizes = [16, 128], strides = [1, 1]} : vector<48x256xf32> to vector<16x128xf32>
    %12 = vector.extract_strided_slice %7 {offsets = [32, 0], sizes = [16, 128], strides = [1, 1]} : vector<48x256xf32> to vector<16x128xf32>
    %13 = vector.extract_strided_slice %7 {offsets = [32, 128], sizes = [16, 128], strides = [1, 1]} : vector<48x256xf32> to vector<16x128xf32>
    %14 = arith.mulf %9, %9 : vector<16x128xf32>
    %15 = arith.mulf %11, %11 : vector<16x128xf32>
    %16 = arith.addf %14, %15 : vector<16x128xf32>
    %17 = arith.mulf %13, %13 : vector<16x128xf32>
    %18 = arith.addf %16, %17 : vector<16x128xf32>
    %19 = math.sqrt %18 : vector<16x128xf32>
    %20 = arith.truncf %19 : vector<16x128xf32> to vector<16x128xbf16>
    %21 = tpu.concatenate %20, %0 in 1 : vector<16x128xbf16>, vector<16x128xbf16> -> vector<16x256xbf16>
    %c0_8 = arith.constant 0 : index
    %c0_9 = arith.constant 0 : index
    %22 = vector.load %arg5[%c0_8, %c0_9] : memref<256x128xbf16, #tpu.memory_space<vmem>>, vector<256x128xbf16>
    %cst_10 = arith.constant dense<0.000000e+00> : vector<16x128xf32>
    %23 = tpu.matmul %21, %22, %cst_10 {dimension_numbers = #tpu.dot_dimension_numbers<[1], [0], [0], [1], [0, 0, 1, 1], [], []>} : vector<16x256xbf16>, vector<256x128xbf16>, vector<16x128xf32> -> vector<16x128xf32>
    %c0_11 = arith.constant 0 : index
    %c0_12 = arith.constant 0 : index
    %24 = vector.load %arg6[%c0_11, %c0_12] : memref<1x128xf32, #tpu.memory_space<vmem>>, vector<1x128xf32>
    %25 = vector.broadcast %24 : vector<1x128xf32> to vector<16x128xf32>
    %26 = arith.addf %23, %25 : vector<16x128xf32>
    %27 = arith.truncf %26 : vector<16x128xf32> to vector<16x128xbf16>
    %28 = arith.negf %27 : vector<16x128xbf16>
    %29 = math.exp %28 : vector<16x128xbf16>
    %cst_13 = arith.constant 1.000000e+00 : bf16
    %30 = vector.broadcast %cst_13 : bf16 to vector<16x128xbf16>
    %31 = arith.addf %30, %29 : vector<16x128xbf16>
    %32 = arith.divf %30, %31 : vector<16x128xbf16>
    %33 = arith.mulf %27, %32 : vector<16x128xbf16>
    %c0_14 = arith.constant 0 : index
    %c0_15 = arith.constant 0 : index
    %34 = vector.load %arg7[%c0_14, %c0_15] : memref<128x384xbf16, #tpu.memory_space<vmem>>, vector<128x384xbf16>
    %cst_16 = arith.constant dense<0.000000e+00> : vector<16x384xf32>
    %35 = tpu.matmul %33, %34, %cst_16 {dimension_numbers = #tpu.dot_dimension_numbers<[1], [0], [0], [1], [0, 0, 1, 1], [], []>} : vector<16x128xbf16>, vector<128x384xbf16>, vector<16x384xf32> -> vector<16x384xf32>
    %c0_17 = arith.constant 0 : index
    %c0_18 = arith.constant 0 : index
    %36 = vector.load %arg8[%c0_17, %c0_18] : memref<1x384xf32, #tpu.memory_space<vmem>>, vector<1x384xf32>
    %37 = vector.broadcast %36 : vector<1x384xf32> to vector<16x384xf32>
    %38 = arith.addf %35, %37 : vector<16x384xf32>
    %39 = vector.extract_strided_slice %38 {offsets = [0, 0], sizes = [16, 128], strides = [1, 1]} : vector<16x384xf32> to vector<16x128xf32>
    %40 = vector.extract_strided_slice %38 {offsets = [0, 128], sizes = [16, 128], strides = [1, 1]} : vector<16x384xf32> to vector<16x128xf32>
    %41 = vector.extract_strided_slice %38 {offsets = [0, 256], sizes = [16, 128], strides = [1, 1]} : vector<16x384xf32> to vector<16x128xf32>
    %42 = arith.mulf %8, %9 : vector<16x128xf32>
    %43 = arith.mulf %10, %11 : vector<16x128xf32>
    %44 = arith.addf %42, %43 : vector<16x128xf32>
    %45 = arith.mulf %12, %13 : vector<16x128xf32>
    %46 = arith.addf %44, %45 : vector<16x128xf32>
    %47 = arith.extf %0 : vector<16x128xbf16> to vector<16x128xf32>
    %48 = arith.mulf %46, %40 : vector<16x128xf32>
    %49 = arith.addf %47, %48 : vector<16x128xf32>
    %50 = arith.addf %49, %41 : vector<16x128xf32>
    %51 = arith.truncf %50 : vector<16x128xf32> to vector<16x128xbf16>
    %c0_19 = arith.constant 0 : index
    %c0_20 = arith.constant 0 : index
    %52 = vector.load %arg9[%c0_19, %c0_20] : memref<16x128xbf16, #tpu.memory_space<vmem>>, vector<16x128xbf16>
    tpu.vector_store %arg9[%c0_19, %c0_20], %51 {strides = array<i32>} : memref<16x128xbf16, #tpu.memory_space<vmem>>, vector<16x128xbf16>,
    %53 = vector.extract_strided_slice %2 {offsets = [0, 0], sizes = [16, 128], strides = [1, 1]} : vector<48x128xbf16> to vector<16x128xbf16>
    %54 = arith.extf %53 : vector<16x128xbf16> to vector<16x128xf32>
    %55 = vector.extract_strided_slice %2 {offsets = [16, 0], sizes = [16, 128], strides = [1, 1]} : vector<48x128xbf16> to vector<16x128xbf16>
    %56 = arith.extf %55 : vector<16x128xbf16> to vector<16x128xf32>
    %57 = vector.extract_strided_slice %2 {offsets = [32, 0], sizes = [16, 128], strides = [1, 1]} : vector<48x128xbf16> to vector<16x128xbf16>
    %58 = arith.extf %57 : vector<16x128xbf16> to vector<16x128xf32>
    %59 = arith.mulf %39, %8 : vector<16x128xf32>
    %60 = arith.addf %54, %59 : vector<16x128xf32>
    %61 = arith.truncf %60 : vector<16x128xf32> to vector<16x128xbf16>
    %c0_21 = arith.constant 0 : index
    %c0_22 = arith.constant 0 : index
    %c0_23 = arith.constant 0 : index
    %62 = vector.load %arg10[%c0_21, %c0_22, %c0_23] : memref<3x16x128xbf16, #tpu.memory_space<vmem>>, vector<1x16x128xbf16>
    %63 = vector.shape_cast %62 : vector<1x16x128xbf16> to vector<16x128xbf16>
    %64 = vector.shape_cast %61 : vector<16x128xbf16> to vector<1x16x128xbf16>
    tpu.vector_store %arg10[%c0_21, %c0_22, %c0_23], %64 {strides = array<i32>} : memref<3x16x128xbf16, #tpu.memory_space<vmem>>, vector<1x16x128xbf16>,
    %65 = arith.mulf %39, %10 : vector<16x128xf32>
    %66 = arith.addf %56, %65 : vector<16x128xf32>
    %67 = arith.truncf %66 : vector<16x128xf32> to vector<16x128xbf16>
    %c1 = arith.constant 1 : index
    %c0_24 = arith.constant 0 : index
    %c0_25 = arith.constant 0 : index
    %68 = vector.load %arg10[%c1, %c0_24, %c0_25] : memref<3x16x128xbf16, #tpu.memory_space<vmem>>, vector<1x16x128xbf16>
    %69 = vector.shape_cast %68 : vector<1x16x128xbf16> to vector<16x128xbf16>
    %70 = vector.shape_cast %67 : vector<16x128xbf16> to vector<1x16x128xbf16>
    tpu.vector_store %arg10[%c1, %c0_24, %c0_25], %70 {strides = array<i32>} : memref<3x16x128xbf16, #tpu.memory_space<vmem>>, vector<1x16x128xbf16>,
    %71 = arith.mulf %39, %12 : vector<16x128xf32>
    %72 = arith.addf %58, %71 : vector<16x128xf32>
    %73 = arith.truncf %72 : vector<16x128xf32> to vector<16x128xbf16>
    %c2 = arith.constant 2 : index
    %c0_26 = arith.constant 0 : index
    %c0_27 = arith.constant 0 : index
    %74 = vector.load %arg10[%c2, %c0_26, %c0_27] : memref<3x16x128xbf16, #tpu.memory_space<vmem>>, vector<1x16x128xbf16>
    %75 = vector.shape_cast %74 : vector<1x16x128xbf16> to vector<16x128xbf16>
    %76 = vector.shape_cast %73 : vector<16x128xbf16> to vector<1x16x128xbf16>
    tpu.vector_store %arg10[%c2, %c0_26, %c0_27], %76 {strides = array<i32>} : memref<3x16x128xbf16, #tpu.memory_space<vmem>>, vector<1x16x128xbf16>,
    return
  }
  func.func @transform_0(%arg0: i32) -> (i32, i32) {
    %c0_i32 = arith.constant 0 : i32
    %c0_i32_0 = arith.constant 0 : i32
    return %arg0, %c0_i32 : i32, i32
  }
  func.func @transform_1(%arg0: i32) -> (i32, i32, i32) {
    %c0_i32 = arith.constant 0 : i32
    %c0_i32_0 = arith.constant 0 : i32
    %c0_i32_1 = arith.constant 0 : i32
    return %c0_i32, %arg0, %c0_i32_0 : i32, i32, i32
  }
  func.func @transform_2(%arg0: i32) -> (i32, i32) {
    %c0_i32 = arith.constant 0 : i32
    %c0_i32_0 = arith.constant 0 : i32
    %c0_i32_1 = arith.constant 0 : i32
    return %c0_i32, %c0_i32_0 : i32, i32
  }
  func.func @transform_3(%arg0: i32) -> (i32, i32) {
    %c0_i32 = arith.constant 0 : i32
    %c0_i32_0 = arith.constant 0 : i32
    %c0_i32_1 = arith.constant 0 : i32
    return %c0_i32, %c0_i32_0 : i32, i32
  }
  func.func @transform_4(%arg0: i32) -> (i32, i32) {
    %c0_i32 = arith.constant 0 : i32
    %c0_i32_0 = arith.constant 0 : i32
    %c0_i32_1 = arith.constant 0 : i32
    return %c0_i32, %c0_i32_0 : i32, i32
  }
  func.func @transform_5(%arg0: i32) -> (i32, i32) {
    %c0_i32 = arith.constant 0 : i32
    %c0_i32_0 = arith.constant 0 : i32
    %c0_i32_1 = arith.constant 0 : i32
    return %c0_i32, %c0_i32_0 : i32, i32
  }
  func.func @transform_6(%arg0: i32) -> (i32, i32) {
    %c0_i32 = arith.constant 0 : i32
    %c0_i32_0 = arith.constant 0 : i32
    %c0_i32_1 = arith.constant 0 : i32
    return %c0_i32, %c0_i32_0 : i32, i32
  }
  func.func @transform_7(%arg0: i32) -> (i32, i32) {
    %c0_i32 = arith.constant 0 : i32
    %c0_i32_0 = arith.constant 0 : i32
    %c0_i32_1 = arith.constant 0 : i32
    return %c0_i32, %c0_i32_0 : i32, i32
  }
  func.func @transform_8(%arg0: i32) -> (i32, i32) {
    %c0_i32 = arith.constant 0 : i32
    %c0_i32_0 = arith.constant 0 : i32
    return %arg0, %c0_i32 : i32, i32
  }
  func.func @transform_9(%arg0: i32) -> (i32, i32, i32) {
    %c0_i32 = arith.constant 0 : i32
    %c0_i32_0 = arith.constant 0 : i32
    %c0_i32_1 = arith.constant 0 : i32
    return %c0_i32, %arg0, %c0_i32_0 : i32, i32, i32
  }
}

</mosaic_0001>

<bundles_post_ra>
// kernel: tpu_custom_call.1
= control target key start
LH: loop header
LB: loop body
LE: loop exit
PB: predicated region body
PF: predicated region fallthrough
CT: control target
= control target key end

     0   :  { %15 = vsyncpa [#allocation3], 0  ;;  %s1565_s0 = inlined_call_operand.hbm [shape: bf16[16,128], index: 0, kind: input, shape index: {}]   ;;  %s1566_s1 = inlined_call_operand.hbm [shape: bf16[3,16,128], index: 1, kind: input, shape index: {}]   ;;  %s1567_s2 = inlined_call_operand.hbm [shape: bf16[128,256], index: 2, kind: input, shape index: {}]   ;;  %s1568_s3 = inlined_call_operand.vmem [shape: f32[1,256], index: 3, kind: input, shape index: {}]   ;;  %s1569_s4 = inlined_call_operand.hbm [shape: bf16[256,128], index: 4, kind: input, shape index: {}]   ;;  %s1570_s5 = inlined_call_operand.vmem [shape: f32[1,128], index: 5, kind: input, shape index: {}]   ;;  %s1571_s6 = inlined_call_operand.hbm [shape: bf16[128,384], index: 6, kind: input, shape index: {}]   ;;  %s1572_s7 = inlined_call_operand.vmem [shape: f32[1,384], index: 7, kind: input, shape index: {}]   ;;  %s1573_s8 = inlined_call_operand.hbm [shape: bf16[16,128], index: 8, kind: output, shape index: {0}]   ;;  %s1574_s9 = inlined_call_operand.hbm [shape: bf16[3,16,128], index: 9, kind: output, shape index: {1}]  }
   0x1   :  { %16 = vsyncpa [#allocation6], 0 }
   0x2   :  { %17 = vsyncpa [#allocation9], 0 }
   0x3   :  { %18 = vsyncpa [#allocation4], 0 }
   0x4   :  { %19 = vsyncpa [#allocation13], 0  ;;  %s1307_s30 = smov [#allocation5]   ;;  %s1308_s11 = smov [#allocation8]  }
   0x5   :  { %s37_s10 = sshll.u32 %s1307_s30, 4  ;;  %s63_s12 = sshll.u32 %s1308_s11, 4  ;;  %s38_s10 = int_to_ptr.vmem [resolvable:$true] %s37_s10  ;;  %s1373_s12 = int_to_ptr.vmem [resolvable:$true] %s63_s12 }
   0x6   :  { %s1143_s15 = scalar_lea.hbm %s1566_s1, 384 }
   0x7   :  { %p1144_p0 = scmp.ne.s32.totalorder %s1566_s1, %s1143_s15  ;;  %p1147_p1 = scmp.lt.u32.totalorder %s1143_s15, %s1566_s1 }
   0x9   :  { %p1149_p2 = pnand %p1147_p1, %p1144_p0 }
   0xb   :  { %1152 = shalt.err (!%p1149_p2)
}
   0xc   :  { %s1153_s20 = scalar_lea.vmem %s38_s10, 384  ;;  %p1158_p4 = scmp.lt.s32.totalorder %s38_s10, %s38_s10 }
   0xd   :  { %p1154_p3 = scmp.ne.s32.totalorder %s38_s10, %s1153_s20  ;;  %p1159_p5 = scmp.lt.s32.totalorder %s1153_s20, %s1153_s20 }
   0xf   :  { %p1160_p6 = por %p1159_p5, %p1158_p4 }
  0x11   :  { %p1161_p7 = pnand %p1160_p6, %p1154_p3 }
  0x13   :  { %1164 = shalt.err (!%p1161_p7)
}
  0x14   :  { %s1309_s21 = smov 64   ;;  %s1310_s22 = smov 4  }
  0x15   :  { %43 = dma.hbm_to_vmem [thread:$0]  %s1566_s1, 384, %s38_s10, [#allocation6], %s1309_s21, %s1309_s21, %s1310_s22  }
  0x16   :  { %s1165_s27 = scalar_lea.hbm %s1569_s4, 2048 }
  0x17   :  { %p1166_p8 = scmp.ne.s32.totalorder %s1569_s4, %s1165_s27  ;;  %p1169_p9 = scmp.lt.u32.totalorder %s1165_s27, %s1569_s4 }
  0x19   :  { %p1171_p10 = pnand %p1169_p9, %p1166_p8 }
  0x1b   :  { %1174 = shalt.err (!%p1171_p10)
}
  0x1c   :  { %s1175_s13 = scalar_lea.vmem %s1373_s12, 2048  ;;  %p1180_p12 = scmp.lt.s32.totalorder %s1373_s12, %s1373_s12 }
  0x1d   :  { %p1176_p11 = scmp.ne.s32.totalorder %s1373_s12, %s1175_s13  ;;  %p1181_p13 = scmp.lt.s32.totalorder %s1175_s13, %s1175_s13 }
  0x1f   :  { %p1182_p0 = por %p1181_p13, %p1180_p12 }
  0x21   :  { %p1183_p1 = pnand %p1182_p0, %p1176_p11 }
  0x23   :  { %1186 = shalt.err (!%p1183_p1)
}
  0x24   :  { %69 = dma.hbm_to_vmem [thread:$0]  %s1569_s4, 2048, %s1373_s12, [#allocation9], %s1309_s21, %s1309_s21, %s1310_s22  }
  0x25   :  { %s1311_s14 = smov [#allocation2]   ;;  %s1312_s16 = smov [#allocation7]  }
  0x26   :  { %s25_s15 = sshll.u32 %s1311_s14, 4  ;;  %s49_s17 = sshll.u32 %s1312_s16, 4  ;;  %s26_s15 = int_to_ptr.vmem [resolvable:$true] %s25_s15  ;;  %s1410_s17 = int_to_ptr.vmem [resolvable:$true] %s49_s17 }
  0x27   :  { %s1187_s20 = scalar_lea.hbm %s1565_s0, 128 }
  0x28   :  { %p1188_p2 = scmp.ne.s32.totalorder %s1565_s0, %s1187_s20  ;;  %p1191_p3 = scmp.lt.u32.totalorder %s1187_s20, %s1565_s0 }
  0x2a   :  { %p1193_p4 = pnand %p1191_p3, %p1188_p2 }
  0x2c   :  { %1196 = shalt.err (!%p1193_p4)
}
  0x2d   :  { %s1197_s4 = scalar_lea.vmem %s26_s15, 128  ;;  %p1202_p6 = scmp.lt.s32.totalorder %s26_s15, %s26_s15 }
  0x2e   :  { %p1198_p5 = scmp.ne.s32.totalorder %s26_s15, %s1197_s4  ;;  %p1203_p7 = scmp.lt.s32.totalorder %s1197_s4, %s1197_s4 }
  0x30   :  { %p1204_p8 = por %p1203_p7, %p1202_p6 }
  0x32   :  { %p1205_p9 = pnand %p1204_p8, %p1198_p5 }
  0x34   :  { %1208 = shalt.err (!%p1205_p9)
}
  0x35   :  { %31 = dma.hbm_to_vmem [thread:$0]  %s1565_s0, 128, %s26_s15, [#allocation3], %s1309_s21, %s1309_s21, %s1310_s22  }
  0x36   :  { %s1209_s30 = scalar_lea.hbm %s1567_s2, 2048 }
  0x37   :  { %p1210_p10 = scmp.ne.s32.totalorder %s1567_s2, %s1209_s30  ;;  %p1213_p11 = scmp.lt.u32.totalorder %s1209_s30, %s1567_s2 }
  0x39   :  { %p1215_p12 = pnand %p1213_p11, %p1210_p10 }
  0x3b   :  { %1218 = shalt.err (!%p1215_p12)
}
  0x3c   :  { %s1219_s14 = scalar_lea.vmem %s1410_s17, 2048  ;;  %p1224_p0 = scmp.lt.s32.totalorder %s1410_s17, %s1410_s17 }
  0x3d   :  { %p1220_p13 = scmp.ne.s32.totalorder %s1410_s17, %s1219_s14  ;;  %p1225_p1 = scmp.lt.s32.totalorder %s1219_s14, %s1219_s14 }
  0x3f   :  { %p1226_p2 = por %p1225_p1, %p1224_p0 }
  0x41   :  { %p1227_p3 = pnand %p1226_p2, %p1220_p13 }
  0x43   :  { %1230 = shalt.err (!%p1227_p3)
}
  0x44   :  { %s1313_s0 = smov 128   ;;  %s1314_s15 = smov 8  }
  0x45   :  { %55 = dma.hbm_to_vmem [thread:$0]  %s1567_s2, 2048, %s1410_s17, [#allocation6], %s1313_s0, %s1313_s0, %s1314_s15  }
  0x46   :  { %s1315_s19 = smov [#allocation10]   ;;  %s1231_s25 = scalar_lea.hbm %s1571_s6, 3072 }
  0x47   :  { %s77_s20 = sshll.u32 %s1315_s19, 4  ;;  %p1232_p4 = scmp.ne.s32.totalorder %s1571_s6, %s1231_s25  ;;  %s78_s20 = int_to_ptr.vmem [resolvable:$true] %s77_s20 }
  0x48   :  { %p1235_p5 = scmp.lt.u32.totalorder %s1231_s25, %s1571_s6 }
  0x4a   :  { %p1237_p6 = pnand %p1235_p5, %p1232_p4 }
  0x4c   :  { %1240 = shalt.err (!%p1237_p6)
}
  0x4d   :  { %s1241_s28 = scalar_lea.vmem %s78_s20, 3072  ;;  %p1246_p8 = scmp.lt.s32.totalorder %s78_s20, %s78_s20 }
  0x4e   :  { %p1242_p7 = scmp.ne.s32.totalorder %s78_s20, %s1241_s28  ;;  %p1247_p9 = scmp.lt.s32.totalorder %s1241_s28, %s1241_s28 }
  0x50   :  { %p1248_p10 = por %p1247_p9, %p1246_p8 }
  0x52   :  { %p1249_p11 = pnand %p1248_p10, %p1242_p7 }
  0x54   :  { %1252 = shalt.err (!%p1249_p11)
}
  0x55   :  { %s1316_s2 = smov 192   ;;  %s1317_s17 = smov 12  }
  0x56   :  { %83 = dma.hbm_to_vmem [thread:$0]  %s1571_s6, 3072, %s78_s20, [#allocation9], %s1316_s2, %s1316_s2, %s1317_s17  }
  0x57   :  { %1297 = dma.done.wait [#allocation3], 128  }
  0x58   :  { %1298 = vsyncadd [#allocation3], 4294967168 }
  0x59   :  { %1299 = dma.done.wait [#allocation6], 2432  }
  0x5a   :  { %1300 = vsyncadd [#allocation6], 4294964864 }
  0x5b   :  { %1301 = dma.done.wait [#allocation9], 5120  }
  0x5c   :  { %1302 = vsyncadd [#allocation9], 4294962176  ;;  %v1318_v0 = vmov 0   ;;  %v1055_v1 = vld [vmem:[#allocation7 + $0x4] ss:$8 sps:$4 sm:$0xff]   ;;  %v1459_v18 = vld [vmem:[#allocation5 + $0x8] sm:$0xff]   ;;  %v129_v37 = vlaneseq }
  0x5d   :  { %269 = vmatprep.mubr.bf16.mxu0 %v1318_v0  ;;  %v1057_v2 = vld [vmem:[#allocation7] ss:$8 sps:$4 sm:$0xff]   ;;  %237 = vmatprep.subr.bf16.mxu0 %v1055_v1  ;;  %v1058_v3 = vld [vmem:[#allocation7 + $0x14] ss:$8 sps:$4 sm:$0xff]   ;;  %v1060_v4 = vld [vmem:[#allocation7 + $0x10] ss:$8 sps:$4 sm:$0xff]  }
  0x5e   :  { %238 = vmatpush1.bf16.msra.mxu0 %v1057_v2  ;;  %v1061_v5 = vld [vmem:[#allocation7 + $0x24] ss:$8 sps:$4 sm:$0xff]   ;;  %v1063_v6 = vld [vmem:[#allocation7 + $0x20] ss:$8 sps:$4 sm:$0xff]   ;;  %v1064_v7 = vld [vmem:[#allocation7 + $0x34] ss:$8 sps:$4 sm:$0xff]  }
  0x5f   :  { %239 = vmatprep.subr.bf16.mxu0 %v1058_v3  ;;  %v1066_v8 = vld [vmem:[#allocation7 + $0x30] ss:$8 sps:$4 sm:$0xff]   ;;  %v1067_v9 = vld [vmem:[#allocation7 + $0x44] ss:$8 sps:$4 sm:$0xff]   ;;  %v1069_v10 = vld [vmem:[#allocation7 + $0x40] ss:$8 sps:$4 sm:$0xff]  }
  0x60   :  { %v1070_v11 = vld [vmem:[#allocation7 + $0x54] ss:$8 sps:$4 sm:$0xff]   ;;  %v1072_v12 = vld [vmem:[#allocation7 + $0x50] ss:$8 sps:$4 sm:$0xff]   ;;  %v1073_v13 = vld [vmem:[#allocation7 + $0x64] ss:$8 sps:$4 sm:$0xff]  }
  0x61   :  { %v1075_v14 = vld [vmem:[#allocation7 + $0x60] ss:$8 sps:$4 sm:$0xff]   ;;  %v1076_v15 = vld [vmem:[#allocation7 + $0x74] ss:$8 sps:$4 sm:$0xff]   ;;  %v1078_v16 = vld [vmem:[#allocation7 + $0x70] ss:$8 sps:$4 sm:$0xff]  }
  0x62   :  { %240 = vmatpush1.bf16.msra.mxu0 %v1060_v4  ;;  %v1456_v17 = vld [vmem:[#allocation5] sm:$0xff]   ;;  %v1462_v19 = vld [vmem:[#allocation5 + $0x10] sm:$0xff]   ;;  %v1082_v20 = vld [vmem:[#allocation8 + $0x40] sm:$0xff]   ;;  %v1468_v38 = vshrl.u32 %v129_v37, 7  ;;  %vm1320_vm4 = vmmov 0   ;;  %s1322_s14 = smov [#allocation11]  }
  0x63   :  { %241 = vmatprep.subr.bf16.mxu0 %v1061_v5  ;;  %v1083_v21 = vld [vmem:[#allocation8] sm:$0xff]   ;;  %988 = vmatprep.subr.bf16.mxu1 %v1082_v20  ;;  %v1084_v22 = vld [vmem:[#allocation8 + $0x48] sm:$0xff]   ;;  %v1086_v24 = vld [vmem:[#allocation8 + $0x50] sm:$0xff]   ;;  %s860_s0 = sshll.u32 %s1322_s14, 4  ;;  %s1528_s0 = int_to_ptr.vmem [resolvable:$true] %s860_s0 }
  0x64   :  { %989 = vmatpush3.bf16.msra.mxu1 %v1083_v21  ;;  %v1085_v23 = vld [vmem:[#allocation8 + $0x8] sm:$0xff]   ;;  %v1087_v25 = vld [vmem:[#allocation8 + $0x10] sm:$0xff]   ;;  %v1088_v26 = vld [vmem:[#allocation8 + $0x58] sm:$0xff]   ;;  %v131_v39 = vsub.s32 0, %v1468_v38  ;;  %v135_v41 = vsub.s32 1, %v1468_v38 }
  0x65   :  { %990 = vmatprep.subr.bf16.mxu1 %v1084_v22  ;;  %v1089_v27 = vld [vmem:[#allocation8 + $0x18] sm:$0xff]   ;;  %v1090_v28 = vld [vmem:[#allocation8 + $0x60] sm:$0xff]   ;;  %v1092_v30 = vld [vmem:[#allocation8 + $0x68] sm:$0xff]  }
  0x66   :  { %242 = vmatpush1.bf16.msra.mxu0 %v1063_v6  ;;  %v1091_v29 = vld [vmem:[#allocation8 + $0x20] sm:$0xff]   ;;  %v1093_v31 = vld [vmem:[#allocation8 + $0x28] sm:$0xff]   ;;  %v1094_v33 = vld [vmem:[#allocation8 + $0x70] sm:$0xff]  }
  0x67   :  { %243 = vmatprep.subr.bf16.mxu0 %v1064_v7  ;;  %v1465_v32 = vld [vmem:[#allocation2] sm:$0xff]   ;;  %v1095_v34 = vld [vmem:[#allocation8 + $0x30] sm:$0xff]   ;;  %v1096_v35 = vld [vmem:[#allocation8 + $0x78] sm:$0xff]  }
  0x68   :  { %991 = vmatpush3.bf16.msra.mxu1 %v1085_v23  ;;  %498 = vmatprep.mubr.bf16.mxu1 %v1465_v32  ;;  %v1097_v36 = vld [vmem:[#allocation8 + $0x38] sm:$0xff]   ;;  %v127_v40 = vld [vmem:[%s1568_s3] sm:$0x3] }
  0x69   :  { %992 = vmatprep.subr.bf16.mxu1 %v1086_v24  ;;  %v132_v42 = vrot.slane %v127_v40, %v131_v39  ;;  %v136_v43 = vrot.slane %v127_v40, %v135_v41 }
  0x6a   :  { %244 = vmatpush1.bf16.msra.mxu0 %v1066_v8 }
  0x6b   :  { %245 = vmatprep.subr.bf16.mxu0 %v1067_v9 }
  0x6c   :  { %993 = vmatpush3.bf16.msra.mxu1 %v1087_v25 }
  0x6d   :  { %994 = vmatprep.subr.bf16.mxu1 %v1088_v26 }
  0x6e   :  { %246 = vmatpush1.bf16.msra.mxu0 %v1069_v10 }
  0x6f   :  { %247 = vmatprep.subr.bf16.mxu0 %v1070_v11 }
  0x70   :  { %995 = vmatpush3.bf16.msra.mxu1 %v1089_v27 }
  0x71   :  { %996 = vmatprep.subr.bf16.mxu1 %v1090_v28 }
  0x72   :  { %248 = vmatpush1.bf16.msra.mxu0 %v1072_v12 }
  0x73   :  { %249 = vmatprep.subr.bf16.mxu0 %v1073_v13 }
  0x74   :  { %997 = vmatpush3.bf16.msra.mxu1 %v1091_v29 }
  0x75   :  { %998 = vmatprep.subr.bf16.mxu1 %v1092_v30 }
  0x76   :  { %250 = vmatpush1.bf16.msra.mxu0 %v1075_v14 }
  0x77   :  { %251 = vmatprep.subr.bf16.mxu0 %v1076_v15 }
  0x78   :  { %999 = vmatpush3.bf16.msra.mxu1 %v1093_v31 }
  0x79   :  { %1000 = vmatprep.subr.bf16.mxu1 %v1094_v33 }
  0x7a   :  { %252 = vmatpush1.bf16.msra.mxu0 %v1078_v16 }
  0x7c   :  { %1001 = vmatpush3.bf16.msra.mxu1 %v1095_v34 }
  0x7d   :  { %270 = vmatmul.mubr.bf16.vlgmr.msra.gmra.mrb[0].mxu0 %v1456_v17  ;;  %1002 = vmatprep.subr.bf16.mxu1 %v1096_v35 }
  0x7e   :  { %279 = vmatprep.mubr.bf16.mxu0 %v1318_v0 }
  0x80   :  { %1003 = vmatpush3.bf16.msra.mxu1 %v1097_v36 }
  0x85   :  { %280 = vmatmul.mubr.bf16.gmra.mrb[4].mxu0 %v1459_v18 }
  0x86   :  { %289 = vmatprep.mubr.bf16.mxu0 %v1318_v0 }
  0x8d   :  { %290 = vmatmul.mubr.bf16.gmra.mrb[8].mxu0 %v1462_v19 }
  0x8e   :  { %725 = vmatprep.mubr.bf16.mxu0 %v1318_v0 }
 0x150   :  { %v271_v44 = vpop.f32.mrb[0].mxu0 }
 0x151   :  { %v1479_v45 = vadd.f32 %v271_v44, %v132_v42  ;;  %v273_v46 = vpop.f32.mrb[1].mxu0  ;;  %v1102_v44 = vld [vmem:[#allocation10 + $0x8] ss:$12 sps:$4 sm:$0xff]  }
 0x152   :  { %v274_v47 = vadd.f32 %v273_v46, %v136_v43  ;;  %v275_v48 = vpop.f32.mrb[2].mxu0  ;;  %v1319_v46 = vmov 0.0  }
 0x153   :  { %v1481_v49 = vadd.f32 %v275_v48, %v132_v42  ;;  %v277_v50 = vpop.f32.mrb[3].mxu0  ;;  %1019 = vmatprep.subr.bf16.mxu1 %v1319_v46  ;;  %v1103_v48 = vld [vmem:[#allocation10 + $0x18] ss:$12 sps:$4 sm:$0xff]  }
 0x154   :  { %v777_v51 = vmul.f32 %v274_v47, %v1479_v45  ;;  %v278_v52 = vadd.f32 %v277_v50, %v136_v43  ;;  %v300_v61 = vmul.f32 %v274_v47, %v274_v47  ;;  %v1105_v47 = vld [vmem:[#allocation10 + $0x1c] ss:$12 sps:$4 sm:$0xff]   ;;  %v1106_v50 = vld [vmem:[#allocation10 + $0x20] ss:$12 sps:$4 sm:$0xff]  }
 0x156   :  { %v778_v53 = vmul.f32 %v278_v52, %v1481_v49  ;;  %v301_v1 = vmul.f32 %v278_v52, %v278_v52  ;;  %v1107_v52 = vld [vmem:[#allocation10 + $0x30] ss:$12 sps:$4 sm:$0xff]  }
 0x158   :  { %v281_v54 = vpop.f32.mrb[4].mxu0 }
 0x159   :  { %v1485_v55 = vadd.f32 %v281_v54, %v132_v42  ;;  %v283_v56 = vpop.f32.mrb[5].mxu0  ;;  %v1113_v54 = vld [vmem:[#allocation10 + $0x4c] ss:$12 sps:$4 sm:$0xff]  }
 0x15a   :  { %v284_v57 = vadd.f32 %v283_v56, %v136_v43  ;;  %v285_v58 = vpop.f32.mrb[6].mxu0  ;;  %v1111_v56 = vld [vmem:[#allocation10 + $0x48] ss:$12 sps:$4 sm:$0xff]  }
 0x15b   :  { %v1487_v59 = vadd.f32 %v285_v58, %v132_v42  ;;  %v287_v60 = vpop.f32.mrb[7].mxu0  ;;  %v1117_v58 = vld [vmem:[#allocation10 + $0x64] ss:$12 sps:$4 sm:$0xff]  }
 0x15c   :  { %v302_v62 = vmul.f32 %v284_v57, %v284_v57  ;;  %v779_v63 = vmul.f32 %v284_v57, %v1485_v55  ;;  %v288_v0 = vadd.f32 %v287_v60, %v136_v43  ;;  %v1114_v57 = vld [vmem:[#allocation10 + $0x50] ss:$12 sps:$4 sm:$0xff]   ;;  %v1115_v60 = vld [vmem:[#allocation10 + $0x60] ss:$12 sps:$4 sm:$0xff]  }
 0x15e   :  { %v304_v2 = vadd.f32 %v302_v62, %v300_v61  ;;  %v781_v3 = vadd.f32 %v779_v63, %v777_v51  ;;  %v303_v4 = vmul.f32 %v288_v0, %v288_v0  ;;  %v780_v5 = vmul.f32 %v288_v0, %v1487_v59  ;;  %v1109_v51 = vld [vmem:[#allocation10 + $0x34] ss:$12 sps:$4 sm:$0xff]   ;;  %v1121_v62 = vld [vmem:[#allocation10 + $0x7c] ss:$12 sps:$4 sm:$0xff]   ;;  %v1119_v63 = vld [vmem:[#allocation10 + $0x78] ss:$12 sps:$4 sm:$0xff]  }
 0x15f   :  { %v1118_v61 = vld [vmem:[#allocation10 + $0x68] ss:$12 sps:$4 sm:$0xff]   ;;  %v1122_v0 = vld [vmem:[#allocation10 + $0x80] ss:$12 sps:$4 sm:$0xff]  }
 0x160   :  { %v305_v6 = vadd.f32 %v303_v4, %v301_v1  ;;  %v782_v7 = vadd.f32 %v780_v5, %v778_v53  ;;  %v291_v8 = vpop.f32.mrb[8].mxu0  ;;  %v1110_v53 = vld [vmem:[#allocation10 + $0x38] ss:$12 sps:$4 sm:$0xff]   ;;  %v1125_v1 = vld [vmem:[#allocation10 + $0x94] ss:$12 sps:$4 sm:$0xff]  }
 0x161   :  { %v1491_v9 = vadd.f32 %v291_v8, %v132_v42  ;;  %v293_v10 = vpop.f32.mrb[9].mxu0  ;;  %v1129_v4 = vld [vmem:[#allocation10 + $0xac] ss:$12 sps:$4 sm:$0xff]   ;;  %v1127_v5 = vld [vmem:[#allocation10 + $0xa8] ss:$12 sps:$4 sm:$0xff]  }
 0x162   :  { %v294_v11 = vadd.f32 %v293_v10, %v136_v43  ;;  %v295_v12 = vpop.f32.mrb[10].mxu0 }
 0x163   :  { %v1493_v13 = vadd.f32 %v295_v12, %v132_v42  ;;  %v297_v14 = vpop.f32.mrb[11].mxu0  ;;  %v1101_v42 = vld [vmem:[#allocation10 + $0x4] ss:$12 sps:$4 sm:$0xff]   ;;  %v910_v12 = vld [vmem:[%s1570_s5] ss:$0 sm:$0xff]  ;;  %s1321_s5 = smov [#allocation12]  }
 0x164   :  { %v306_v15 = vmul.f32 %v294_v11, %v294_v11  ;;  %v783_v16 = vmul.f32 %v294_v11, %v1491_v9  ;;  %v298_v20 = vadd.f32 %v297_v14, %v136_v43  ;;  %v1099_v43 = vld [vmem:[#allocation10] ss:$12 sps:$4 sm:$0xff]   ;;  %693 = vmatprep.subr.bf16.mxu0 %v1101_v42  ;;  %v806_v42 = vunpack.c.h.bf16 %v1456_v17 }
 0x165   :  { %694 = vmatpush1.bf16.msra.mxu0 %v1099_v43  ;;  %v807_v43 = vunpack.c.l.bf16 %v1459_v18 }
 0x166   :  { %v308_v21 = vadd.f32 %v306_v15, %v304_v2  ;;  %v307_v22 = vmul.f32 %v298_v20, %v298_v20  ;;  %v784_v23 = vmul.f32 %v298_v20, %v1493_v13  ;;  %v1497_v24 = vadd.f32 %v783_v16, %v781_v3  ;;  %695 = vmatprep.subr.bf16.mxu0 %v1105_v47  ;;  %v1123_v2 = vld [vmem:[#allocation10 + $0x90] ss:$12 sps:$4 sm:$0xff]   ;;  %v1126_v3 = vld [vmem:[#allocation10 + $0x98] ss:$12 sps:$4 sm:$0xff]  }
 0x168   :  { %1135 = vrsqrt.f32 %v308_v21  ;;  %v309_v25 = vadd.f32 %v307_v22, %v305_v6  ;;  %v1499_v26 = vadd.f32 %v784_v23, %v782_v7  ;;  %vm312_vm0 = vcmp.eq.f32.partialorder %v308_v21, inf  ;;  %v1130_v6 = vld [vmem:[#allocation10 + $0xb0] ss:$12 sps:$4 sm:$0xff]  }
 0x169   :  { %v315_v33 = vand.u32 2147483648, %v308_v21  ;;  %vm314_vm2 = vcmp.eq.f32.partialorder %v308_v21, 0.0  ;;  %696 = vmatpush1.bf16.msra.mxu0 %v1103_v48 }
 0x16a   :  { %1137 = vrsqrt.f32 %v309_v25  ;;  %vm319_vm1 = vcmp.eq.f32.partialorder %v309_v25, inf  ;;  %v322_v34 = vand.u32 2147483648, %v309_v25  ;;  %vm321_vm3 = vcmp.eq.f32.partialorder %v309_v25, 0.0  ;;  %697 = vmatprep.subr.bf16.mxu0 %v1109_v51 }
 0x16d   :  { %698 = vmatpush1.bf16.msra.mxu0 %v1107_v52 }
 0x16e   :  { %699 = vmatprep.subr.bf16.mxu0 %v1113_v54 }
 0x171   :  { %700 = vmatpush1.bf16.msra.mxu0 %v1111_v56 }
 0x172   :  { %v1136_v27 = vpop.eup %1135  ;;  %701 = vmatprep.subr.bf16.mxu0 %v1117_v58 }
 0x173   :  { %v311_v28 = vmul.f32 %v1136_v27, %v308_v21 }
 0x174   :  { %v1138_v29 = vpop.eup %1137 }
 0x175   :  { %v313_v30 = vsel %vm312_vm0, %v308_v21, %v311_v28  ;;  %v318_v31 = vmul.f32 %v1138_v29, %v309_v25  ;;  %702 = vmatpush1.bf16.msra.mxu0 %v1115_v60  ;;  %v788_v60 = vunpack.c.h.bf16 %v1465_v32 }
 0x176   :  { %v316_v36 = vsel %vm314_vm2, %v315_v33, %v313_v30  ;;  %703 = vmatprep.subr.bf16.mxu0 %v1121_v62  ;;  %v548_v30 = vld [vmem:[%s1572_s7] sm:$0x7]  ;;  %s872_s7 = sshll.u32 %s1321_s5, 4  ;;  %s873_s7 = int_to_ptr.vmem [resolvable:$true] %s872_s7 }
 0x177   :  { %v320_v35 = vsel %vm319_vm1, %v309_v25, %v318_v31  ;;  %v560_v31 = vsub.s32 2, %v1468_v38  ;;  %v553_v33 = vrot.slane %v548_v30, %v131_v39  ;;  %v810_v39 = vunpack.c.h.bf16 %v1462_v19  ;;  %s1253_s15 = scalar_lea.vmem %s873_s7, 384  ;;  %p1258_p13 = scmp.lt.s32.totalorder %s873_s7, %s873_s7 }
 0x178   :  { %v323_v37 = vsel %vm321_vm3, %v322_v34, %v320_v35  ;;  %v557_v34 = vrot.slane %v548_v30, %v135_v41  ;;  %v805_v35 = vunpack.c.l.bf16 %v1456_v17  ;;  %v787_v38 = vunpack.c.l.bf16 %v1465_v32  ;;  %p1254_p12 = scmp.ne.s32.totalorder %s873_s7, %s1253_s15  ;;  %p1259_p0 = scmp.lt.s32.totalorder %s1253_s15, %s1253_s15 }
 0x179   :  { %v324_v40 = vpack.c.bf16 %v323_v37, %v316_v36  ;;  %704 = vmatpush1.bf16.msra.mxu0 %v1119_v63  ;;  %v561_v37 = vrot.slane %v548_v30, %v560_v31 }
 0x17a   :  { %705 = vmatprep.subr.bf16.mxu0 %v1125_v1  ;;  %p1260_p1 = por %p1259_p0, %p1258_p13 }
 0x17b   :  { %499 = vmatmul.mubr.bf16.vlgmr.msra.gmra.mrb[0].mxu1 %v324_v40 }
 0x17c   :  { %1020 = vmatpush3.bf16.msra.mxu1 %v1102_v44  ;;  %1035 = vmatprep.mubr.msk.bf16.mxu1 %vm1320_vm4, %v1319_v46  ;;  %v809_v44 = vunpack.c.l.bf16 %v1462_v19  ;;  %p1261_p2 = pnand %p1260_p1, %p1254_p12 }
 0x17d   :  { %1021 = vmatprep.subr.bf16.mxu1 %v1319_v46  ;;  %706 = vmatpush1.bf16.msra.mxu0 %v1123_v2 }
 0x17e   :  { %707 = vmatprep.subr.bf16.mxu0 %v1129_v4 }
 0x180   :  { %1022 = vmatpush3.bf16.msra.mxu1 %v1106_v50  ;;  %v808_v50 = vunpack.c.h.bf16 %v1459_v18 }
 0x181   :  { %1023 = vmatprep.subr.bf16.mxu1 %v1319_v46  ;;  %708 = vmatpush1.bf16.msra.mxu0 %v1127_v5 }
 0x184   :  { %1024 = vmatpush3.bf16.msra.mxu1 %v1110_v53 }
 0x185   :  { %1025 = vmatprep.subr.bf16.mxu1 %v1319_v46 }
 0x188   :  { %1026 = vmatpush3.bf16.msra.mxu1 %v1114_v57 }
 0x189   :  { %1027 = vmatprep.subr.bf16.mxu1 %v1319_v46 }
 0x18c   :  { %1028 = vmatpush3.bf16.msra.mxu1 %v1118_v61 }
 0x18d   :  { %1029 = vmatprep.subr.bf16.mxu1 %v1319_v46 }
 0x190   :  { %1030 = vmatpush3.bf16.msra.mxu1 %v1122_v0 }
 0x191   :  { %1031 = vmatprep.subr.bf16.mxu1 %v1319_v46 }
 0x194   :  { %1032 = vmatpush3.bf16.msra.mxu1 %v1126_v3 }
 0x195   :  { %1033 = vmatprep.subr.bf16.mxu1 %v1319_v46 }
 0x198   :  { %1034 = vmatpush3.bf16.msra.mxu1 %v1130_v6 }
 0x24e   :  { %v1004_v7 = vpop.f32.mrb[0].mxu1 }
 0x24f   :  { %v1005_v8 = vpop.f32.mrb[1].mxu1 }
 0x250   :  { %v1006_v10 = vadd.f32 %v1005_v8, %v1004_v7  ;;  %v1007_v11 = vpop.f32.mrb[2].mxu1 }
 0x251   :  { %v1008_v14 = vpop.f32.mrb[3].mxu1 }
 0x252   :  { %v1009_v15 = vadd.f32 %v1008_v14, %v1007_v11  ;;  %v501_v16 = vadd.f32 %v1006_v10, %v910_v12 }
 0x254   :  { %v504_v20 = vadd.f32 %v1009_v15, %v910_v12 }
 0x256   :  { %v507_v21 = vpack.c.bf16 %v504_v20, %v501_v16 }
 0x258   :  { %v927_v22 = vmul.bf16 3216621497, %v507_v21 }
 0x25a   :  { %1139 = vpow.bf16 %v927_v22 }
 0x265   :  { %v1140_v23 = vpop.eup %1139 }
 0x266   :  { %v512_v25 = vadd.bf16 1065369472, %v1140_v23 }
 0x268   :  { %1141 = vrcp.bf16 %v512_v25 }
 0x273   :  { %v1142_v27 = vpop.eup %1141 }
 0x274   :  { %v514_v28 = vmul.bf16 1065369472, %v1142_v27 }
 0x276   :  { %v515_v29 = vmul.bf16 %v514_v28, %v507_v21 }
 0x278   :  { %726 = vmatmul.mubr.bf16.vlgmr.msra.gmra.mrb[12].mxu0 %v515_v29  ;;  %1036 = vmatmul.mubr.bf16.vlgmr.msra.gmra.mrb[4].mxu1 %v515_v29 }
 0x34b   :  { %v727_v36 = vpop.f32.mrb[12].mxu0  ;;  %v770_v40 = vpop.f32.mrb[4].mxu1 }
 0x34c   :  { %v728_v46 = vadd.f32 %v727_v36, %v553_v33  ;;  %v729_v47 = vpop.f32.mrb[13].mxu0  ;;  %v1037_v48 = vpop.f32.mrb[5].mxu1  ;;  %v771_v61 = vadd.f32 %v770_v40, %v561_v37 }
 0x34d   :  { %v730_v41 = vadd.f32 %v729_v47, %v557_v34  ;;  %v731_v51 = vpop.f32.mrb[14].mxu0  ;;  %v773_v52 = vpop.f32.mrb[6].mxu1 }
 0x34e   :  { %v811_v53 = vmul.f32 %v728_v46, %v1479_v45  ;;  %v825_v17 = vmul.f32 %v728_v46, %v1485_v55  ;;  %v840_v54 = vmul.f32 %v728_v46, %v1491_v9  ;;  %v732_v56 = vadd.f32 %v731_v51, %v553_v33  ;;  %v733_v57 = vpop.f32.mrb[15].mxu0  ;;  %v1038_v58 = vpop.f32.mrb[7].mxu1 }
 0x34f   :  { %v789_v18 = vmul.f32 %v1497_v24, %v730_v41  ;;  %v734_v19 = vadd.f32 %v733_v57, %v557_v34  ;;  %v774_v4 = vadd.f32 %v773_v52, %v561_v37 }
 0x350   :  { %v813_v62 = vadd.f32 %v811_v53, %v805_v35  ;;  %v827_v63 = vadd.f32 %v825_v17, %v807_v43  ;;  %v842_v0 = vadd.f32 %v840_v54, %v809_v44  ;;  %v812_v1 = vmul.f32 %v732_v56, %v1481_v49 }
 0x351   :  { %v791_v2 = vadd.f32 %v789_v18, %v787_v38  ;;  %v826_v45 = vmul.f32 %v732_v56, %v1487_v59  ;;  %v841_v55 = vmul.f32 %v732_v56, %v1493_v13  ;;  %v790_v9 = vmul.f32 %v1499_v26, %v734_v19 }
 0x352   :  { %v814_v3 = vadd.f32 %v812_v1, %v806_v42 }
 0x353   :  { %v828_v32 = vadd.f32 %v826_v45, %v808_v50  ;;  %v843_v5 = vadd.f32 %v841_v55, %v810_v39  ;;  %v792_v24 = vadd.f32 %v790_v9, %v788_v60  ;;  %v793_v6 = vadd.f32 %v791_v2, %v771_v61 }
 0x354   :  { %v976_v7 = vpack.c.bf16 %v814_v3, %v813_v62 }
 0x355   :  { %v794_v8 = vadd.f32 %v792_v24, %v774_v4  ;;  %v981_v49 = vpack.c.bf16 %v828_v32, %v827_v63  ;;  %v986_v10 = vpack.c.bf16 %v843_v5, %v842_v0 }
 0x356   :  { %977 = vst [vmem:[#allocation12] sm:$0xff] %v976_v7  }
 0x357   :  { %v971_v59 = vpack.c.bf16 %v794_v8, %v793_v6  ;;  %982 = vst [vmem:[#allocation12 + $0x8] sm:$0xff] %v981_v49   ;;  %987 = vst [vmem:[#allocation12 + $0x10] sm:$0xff] %v986_v10  }
 0x358   :  { %1264 = shalt.err (!%p1261_p2)
}
 0x359   :  { %s1265_s19 = scalar_lea.hbm %s1574_s9, 384 }
 0x35a   :  { %p1266_p3 = scmp.ne.s32.totalorder %s1574_s9, %s1265_s19  ;;  %p1269_p4 = scmp.lt.u32.totalorder %s1265_s19, %s1574_s9 }
 0x35c   :  { %p1271_p5 = pnand %p1269_p4, %p1266_p3 }
 0x35e   :  { %1274 = shalt.err (!%p1271_p5)
}
 0x35f   :  { %878 = dma.vmem_to_hbm [thread:$0]  %s873_s7, 384, %s1574_s9, [#allocation13], %s1309_s21, %s1309_s21, %s1310_s22   ;;  %972 = vst [vmem:[#allocation11] sm:$0xff] %v971_v59  }
 0x360   :  { %s1275_s12 = scalar_lea.vmem %s1528_s0, 128  ;;  %p1280_p7 = scmp.lt.s32.totalorder %s1528_s0, %s1528_s0 }
 0x361   :  { %p1276_p6 = scmp.ne.s32.totalorder %s1528_s0, %s1275_s12  ;;  %p1281_p8 = scmp.lt.s32.totalorder %s1275_s12, %s1275_s12 }
 0x363   :  { %p1282_p9 = por %p1281_p8, %p1280_p7 }
 0x365   :  { %p1283_p10 = pnand %p1282_p9, %p1276_p6 }
 0x367   :  { %1286 = shalt.err (!%p1283_p10)
}
 0x368   :  { %s1287_s2 = scalar_lea.hbm %s1573_s8, 128 }
 0x369   :  { %p1288_p11 = scmp.ne.s32.totalorder %s1573_s8, %s1287_s2  ;;  %p1291_p12 = scmp.lt.u32.totalorder %s1287_s2, %s1573_s8 }
 0x36b   :  { %p1293_p13 = pnand %p1291_p12, %p1288_p11 }
 0x36d   :  { %1296 = shalt.err (!%p1293_p13)
}
 0x36e   :  { %866 = dma.vmem_to_hbm [thread:$0]  %s1528_s0, 128, %s1573_s8, [#allocation4], %s1309_s21, %s1309_s21, %s1310_s22  }
 0x36f   :  { %1303 = dma.done.wait [#allocation4], 128  }
 0x370   :  { %1304 = vsyncadd [#allocation4], 4294967168 }
 0x371   :  { %1305 = dma.done.wait [#allocation13], 384  }
 0x372   :  { %1306 = vsyncadd [#allocation13], 4294966912 }
 0x373   :  { %885 = vsyncpa [#allocation3], 1 }
 0x374   :  { %886 = vsyncpa [#allocation6], 1 }
 0x375   :  { %887 = vsyncpa [#allocation9], 1 }
 0x376   :  { %888 = vsyncpa [#allocation4], 1 }
 0x377   :  { %889 = vsyncpa [#allocation13], 1 }

</bundles_post_ra>
